<compile_context>
chip_gen: v7x
topology: tpu7x:2x2x1
jax: 0.10.0
libtpu: 0.0.40
codegen_flags: <defaults>
</compile_context>

<pallas_src>
import functools

import jax
import jax.numpy as jnp
from jax.experimental import pallas as pl
from jax.experimental.pallas import tpu as pltpu


ACT_DTYPE = jnp.bfloat16
VMEM_LIMIT = 32 * 1024 * 1024  # <= half of v7x's 64 MiB per-TC VMEM


# ----------------------------- small helpers -------------------------------

def _silu(x):
    return x * jax.nn.sigmoid(x)


def _pick_tile(m, cap=1024):
    for t in (1024, 512, 256, 128, 64, 32, 16, 8):
        if t <= cap and m % t == 0:
            return t
    return m  # equals the full dim -> legal block


# ----------------- generic fused matmul (+bias, act, residual) --------------

def _mm_kernel(x_ref, w_ref, b_ref, *rest, activation, has_res):
    if has_res:
        r_ref, o_ref = rest
    else:
        (o_ref,) = rest
    acc = jnp.dot(x_ref[...], w_ref[...], preferred_element_type=jnp.float32)
    acc = acc + b_ref[...]
    if activation == "silu":
        acc = _silu(acc)
    if has_res:
        acc = acc + r_ref[...].astype(jnp.float32)   # fused residual add
    o_ref[...] = acc.astype(o_ref.dtype)


def matmul_bias_act(x, w, b, activation="none", residual=None):
    """y = act(x @ w + b) [+ residual]; x is (M, Cin) with batch folded into M."""
    m, cin = x.shape
    cout = w.shape[1]
    t = _pick_tile(m)
    in_specs = [
        pl.BlockSpec((t, cin), lambda i: (i, 0)),
        pl.BlockSpec((cin, cout), lambda i: (0, 0)),
        pl.BlockSpec((1, cout), lambda i: (0, 0)),
    ]
    operands = [x, w, b.reshape(1, cout)]
    if residual is not None:
        in_specs.append(pl.BlockSpec((t, cout), lambda i: (i, 0)))
        operands.append(residual)
    bytes_accessed = (m * cin * 2 + cin * cout * 2 + m * cout * 2
                      + (m * cout * 2 if residual is not None else 0))
    cost = pl.CostEstimate(
        flops=2 * m * cin * cout,
        transcendentals=(m * cout if activation == "silu" else 0),
        bytes_accessed=int(bytes_accessed))
    return pl.pallas_call(
        functools.partial(_mm_kernel, activation=activation,
                          has_res=residual is not None),
        out_shape=jax.ShapeDtypeStruct((m, cout), ACT_DTYPE),
        grid=(m // t,),
        in_specs=in_specs,
        out_specs=pl.BlockSpec((t, cout), lambda i: (i, 0)),
        compiler_params=pltpu.CompilerParams(
            dimension_semantics=("parallel",),
            vmem_limit_bytes=VMEM_LIMIT),
        cost_estimate=cost,
    )(*operands)


# ------- fused depthwise conv + SiLU + GAP + SE-MLP + channel scale ---------
# One grid step = one batch element; the whole (padded) image is resident in
# VMEM, the k*k taps are static stride-1 slices (stride-2 blocks are fed a
# 2x2 phase decomposition so no strided loads are needed in-kernel), and the
# SE gate is computed and applied before the activation is stored to HBM.

def _dw_se_kernel(ph_ref, w_ref, b_ref, w1_ref, b1_ref, w2_ref, b2_ref, o_ref,
                  *, kernel, stride, ho, wo, hp2, row_chunk):
    c = o_ref.shape[-1]
    inv_hw = 1.0 / float(ho * wo)

    gap = jnp.zeros((1, c), jnp.float32)
    for r0 in range(0, ho, row_chunk):
        rows = min(row_chunk, ho - r0)
        acc = jnp.zeros((rows, wo, c), jnp.float32)
        for kh in range(kernel):
            for kw in range(kernel):
                pidx = (kh % stride) * stride + (kw % stride)
                oh, ow = kh // stride, kw // stride
                r = pidx * hp2 + r0 + oh
                acc = acc + (ph_ref[r:r + rows, ow:ow + wo, :].astype(jnp.float32)
                             * w_ref[kh * kernel + kw])
        y = _silu(acc + b_ref[...]).astype(o_ref.dtype)
        o_ref[r0:r0 + rows] = y
        # pool the exact stored (bf16) tensor so the gate matches what the
        # project conv consumes
        gap = gap + jnp.sum(jnp.sum(y.astype(jnp.float32), axis=0),
                            axis=0, keepdims=True)

    # squeeze-excitation MLP on the pooled activation
    s = (gap * inv_hw).astype(ACT_DTYPE)
    h = _silu(jnp.dot(s, w1_ref[...], preferred_element_type=jnp.float32)
              + b1_ref[...])
    gate = jax.nn.sigmoid(
        jnp.dot(h.astype(ACT_DTYPE), w2_ref[...],
                preferred_element_type=jnp.float32) + b2_ref[...])
    gate = gate.astype(o_ref.dtype)            # apply in bf16 (no f32 round trip)

    for r0 in range(0, ho, row_chunk):
        rows = min(row_chunk, ho - r0)
        o_ref[r0:r0 + rows] = o_ref[r0:r0 + rows] * gate


def depthwise_se_conv(x, w, b, w1, b1, w2, b2, kernel, stride):
    """Depthwise conv (pad=(k-1)//2, SiLU) with fused SE gate.

    x NHWC bf16, w (k,k,C) f32, b (C,) f32, SE weights bf16 / f32 biases.
    Returns (y_gated (N,Ho,Wo,C) bf16, ho, wo).
    """
    n, h, wd, c = x.shape
    p = (kernel - 1) // 2
    ho = (h + 2 * p - kernel) // stride + 1
    wo = (wd + 2 * p - kernel) // stride + 1
    xp = jnp.pad(x, ((0, 0), (p, p), (p, p), (0, 0)))
    if stride == 1:
        nph = 1
        hp2, wp2 = xp.shape[1], xp.shape[2]
        phases = xp
    else:
        # 2x2 phase (space-to-depth) split: total data == 1x the input, and the
        # kernel only needs static stride-1 slices per tap.
        hp, wp_ = xp.shape[1], xp.shape[2]
        xp = jnp.pad(xp, ((0, 0), (0, hp % 2), (0, wp_ % 2), (0, 0)))
        nph = stride * stride
        hp2, wp2 = xp.shape[1] // 2, xp.shape[2] // 2
        phases = jnp.stack(
            [xp[:, ph::2, pw::2, :] for ph in range(2) for pw in range(2)],
            axis=1).reshape(n, nph * hp2, wp2, c)
    taps = kernel * kernel
    cse = w1.shape[1]
    row_chunk = max(1, min(ho, (2 * 1024 * 1024) // (4 * wo * c)))
    out = pl.pallas_call(
        functools.partial(_dw_se_kernel, kernel=kernel, stride=stride,
                          ho=ho, wo=wo, hp2=hp2, row_chunk=row_chunk),
        out_shape=jax.ShapeDtypeStruct((n, ho, wo, c), ACT_DTYPE),
        grid=(n,),
        in_specs=[
            pl.BlockSpec((None, nph * hp2, wp2, c), lambda ni: (ni, 0, 0, 0)),
            pl.BlockSpec((taps, 1, c), lambda ni: (0, 0, 0)),
            pl.BlockSpec((1, c), lambda ni: (0, 0)),
            pl.BlockSpec((c, cse), lambda ni: (0, 0)),
            pl.BlockSpec((1, cse), lambda ni: (0, 0)),
            pl.BlockSpec((cse, c), lambda ni: (0, 0)),
            pl.BlockSpec((1, c), lambda ni: (0, 0)),
        ],
        out_specs=pl.BlockSpec((None, ho, wo, c), lambda ni: (ni, 0, 0, 0)),
        compiler_params=pltpu.CompilerParams(
            dimension_semantics=("parallel",),
            vmem_limit_bytes=VMEM_LIMIT),
    )(phases, w.reshape(taps, 1, c), b.reshape(1, c),
      w1, b1.reshape(1, cse), w2, b2.reshape(1, c))
    return out, ho, wo


# ------------- fused tail: head 1x1 conv + SiLU + GAP + classifier ----------

def _head_gap_cls_kernel(x_ref, wh_ref, bh_ref, wc_ref, bc_ref, o_ref, acc_ref,
                         *, inv_hw):
    i = pl.program_id(1)

    @pl.when(i == 0)
    def _():
        acc_ref[...] = jnp.zeros_like(acc_ref)

    h = jnp.dot(x_ref[...], wh_ref[...], preferred_element_type=jnp.float32)
    h = _silu(h + bh_ref[...])
    acc_ref[...] += jnp.sum(h, axis=0, keepdims=True)

    @pl.when(i == pl.num_programs(1) - 1)
    def _():
        pooled = acc_ref[...] * inv_hw                                  # (1,1280)
        logits = (jnp.dot(pooled, wc_ref[...], preferred_element_type=jnp.float32)
                  + bc_ref[...])
        o_ref[...] = logits.astype(o_ref.dtype)


def head_pool_classify(x, wh, bh, wc, bc):
    """x (N,HW,320) -> logits (N,num_classes); head conv never hits HBM."""
    n, hw, cin = x.shape
    chead = wh.shape[1]
    ncls = wc.shape[1]
    t = _pick_tile(hw, cap=512)
    out = pl.pallas_call(
        functools.partial(_head_gap_cls_kernel, inv_hw=1.0 / float(hw)),
        out_shape=jax.ShapeDtypeStruct((n, 1, ncls), jnp.float32),
        grid=(n, hw // t),
        in_specs=[
            pl.BlockSpec((None, t, cin), lambda ni, i: (ni, i, 0)),
            pl.BlockSpec((cin, chead), lambda ni, i: (0, 0)),
            pl.BlockSpec((1, chead), lambda ni, i: (0, 0)),
            pl.BlockSpec((chead, ncls), lambda ni, i: (0, 0)),
            pl.BlockSpec((1, ncls), lambda ni, i: (0, 0)),
        ],
        out_specs=pl.BlockSpec((None, 1, ncls), lambda ni, i: (ni, 0, 0)),
        scratch_shapes=[pltpu.VMEM((1, chead), jnp.float32)],
        compiler_params=pltpu.CompilerParams(
            dimension_semantics=("parallel", "arbitrary"),
            vmem_limit_bytes=VMEM_LIMIT),
    )(x, wh, bh.reshape(1, chead), wc, bc.reshape(1, ncls))
    return out.reshape(n, ncls)


# ---------------------------- stem conv (im2col) ----------------------------

def stem_conv(x, w, b):
    """3x3 stride-2 conv (pad 1) + folded BN + SiLU via im2col + batched matmul."""
    # TODO(synk): the stem im2col still duplicates the 3-channel input 9x in XLA;
    # cheap in absolute terms but could move in-kernel as shifted accumulation.
    n, h, wd, cin = x.shape
    kh, kw, _, cout = w.shape
    p = (kh - 1) // 2
    stride = 2
    xp = jnp.pad(x, ((0, 0), (p, p), (p, p), (0, 0)))
    ho = (h + 2 * p - kh) // stride + 1
    wo = (wd + 2 * p - kw) // stride + 1
    cols = []
    for i in range(kh):
        for j in range(kw):
            cols.append(xp[:, i:i + (ho - 1) * stride + 1:stride,
                              j:j + (wo - 1) * stride + 1:stride, :])
    cols = jnp.stack(cols, axis=3).reshape(n * ho * wo, kh * kw * cin)
    y = matmul_bias_act(cols, w.reshape(kh * kw * cin, cout), b, activation="silu")
    return y.reshape(n, ho, wo, cout)


# --------------------------- parameter construction ------------------------

# EfficientNet-B0 MBConv stages: (expand_ratio, kernel, stride, out_ch, repeats)
STAGES = [
    (1, 3, 1, 16, 1),
    (6, 3, 2, 24, 2),
    (6, 5, 2, 40, 2),
    (6, 3, 2, 80, 3),
    (6, 5, 1, 112, 3),
    (6, 5, 2, 192, 4),
    (6, 3, 1, 320, 1),
]


def _init_conv_bn(key, out_ch, w_shape, w_dtype=ACT_DTYPE, eps=1e-3):
    """Deterministic conv + BN params, BN folded (eval-mode running stats)."""
    kw, kg, kb, km, kv = jax.random.split(key, 5)
    w = jax.random.normal(kw, w_shape, jnp.float32) * 0.05
    gamma = jax.random.uniform(kg, (out_ch,), jnp.float32, 0.5, 1.5)
    beta = jax.random.normal(kb, (out_ch,), jnp.float32) * 0.05
    mean = jax.random.normal(km, (out_ch,), jnp.float32) * 0.05
    var = jax.random.uniform(kv, (out_ch,), jnp.float32, 0.5, 1.5)
    scale = gamma / jnp.sqrt(var + eps)
    return (w * scale).astype(w_dtype), (beta - mean * scale)


def _init_linear(key, cin, cout, w_dtype=jnp.float32):
    kw, kb = jax.random.split(key)
    return (jax.random.normal(kw, (cin, cout), jnp.float32).astype(w_dtype) * 0.05,
            jax.random.normal(kb, (cout,), jnp.float32) * 0.05)


def init_params(key, num_classes=3):
    # TODO(synk): pretrained ImageNet weights cannot be loaded; using
    # deterministic random init with the exact EfficientNet-B0 shapes.
    keys = iter(jax.random.split(key, 256))
    params = {"stem": _init_conv_bn(next(keys), 32, (3, 3, 3, 32))}
    blocks = []
    cin = 32
    for (er, k, s, cout, reps) in STAGES:
        for r in range(reps):
            stride = s if r == 0 else 1
            exp_ch = cin * er
            se_ch = max(1, cin // 4)
            blk = {"expand_ratio": er, "kernel": k, "stride": stride,
                   "cin": cin, "cout": cout}
            if er != 1:
                blk["expand"] = _init_conv_bn(next(keys), exp_ch, (cin, exp_ch))
            blk["dw"] = _init_conv_bn(next(keys), exp_ch, (k, k, exp_ch),
                                      w_dtype=jnp.float32)
            blk["se_reduce"] = _init_linear(next(keys), exp_ch, se_ch,
                                            w_dtype=ACT_DTYPE)
            blk["se_expand"] = _init_linear(next(keys), se_ch, exp_ch,
                                            w_dtype=ACT_DTYPE)
            blk["project"] = _init_conv_bn(next(keys), cout, (exp_ch, cout))
            blocks.append(blk)
            cin = cout
    params["blocks"] = blocks
    params["head"] = _init_conv_bn(next(keys), 1280, (320, 1280))
    params["classifier"] = _init_linear(next(keys), 1280, num_classes)
    return params


# --------------------------------- forward ---------------------------------

def mbconv(x, blk):
    """x (N,H,W,Cin) bf16 -> (N,Ho,Wo,Cout) bf16."""
    n, h, wd, cin = x.shape
    inp_flat = x.reshape(n * h * wd, cin)
    if blk["expand_ratio"] != 1:
        we, be = blk["expand"]
        # TODO(synk): expand 1x1 -> depthwise could be fused into one kernel to
        # keep the 6x-channel activation off HBM entirely; left separate here.
        xe = matmul_bias_act(inp_flat, we, be, activation="silu").reshape(n, h, wd, -1)
    else:
        xe = x
    wd_, bd_ = blk["dw"]
    w1, b1 = blk["se_reduce"]
    w2, b2 = blk["se_expand"]
    y, ho, wo = depthwise_se_conv(xe, wd_, bd_, w1, b1, w2, b2,
                                  blk["kernel"], blk["stride"])
    wp, bp = blk["project"]
    residual = inp_flat if (blk["stride"] == 1 and blk["cin"] == blk["cout"]) else None
    cexp = xe.shape[-1]
    # TODO(synk): StochasticDepth on the residual path is identity (eval mode).
    out = matmul_bias_act(y.reshape(n * ho * wo, cexp), wp, bp,
                          activation="none", residual=residual)
    return out.reshape(n, ho, wo, blk["cout"])


def spine_classifier_forward(params, x_nchw):
    # layout: accept PyTorch NCHW, run NHWC (channels on the lane axis) in bf16.
    x = jnp.transpose(x_nchw, (0, 2, 3, 1)).astype(ACT_DTYPE)
    w, b = params["stem"]
    x = stem_conv(x, w, b)
    for blk in params["blocks"]:
        x = mbconv(x, blk)
    n, h, wd, c = x.shape
    wh, bh = params["head"]
    wc, bc = params["classifier"]
    # TODO(synk): Dropout(p=0.2) before the classifier is identity in eval mode.
    return head_pool_classify(x.reshape(n, h * wd, c), wh, bh, wc, bc)


# ----------------------------------- main -----------------------------------

if __name__ == "__main__":
    key = jax.random.PRNGKey(0)
    k_params, k_input = jax.random.split(key)
    params = init_params(k_params, num_classes=3)
    # small EfficientNet-compatible input (3 channels, spatial 32 -> 1 after /32)
    x = jax.random.normal(k_input, (2, 3, 32, 32), jnp.float32)
    logits = spine_classifier_forward(params, x)
    logits = jax.block_until_ready(logits)
    assert logits.shape == (2, 3), logits.shape
    assert bool(jnp.all(jnp.isfinite(logits)))
    print("KERNEL_OK")
</pallas_src>

<mosaic_0001>
module attributes {stable_mosaic.version = 11 : i64} {
  func.func @_mm_kernel(%arg0: i32, %arg1: memref<512x27xbf16, #tpu.memory_space<vmem>>, %arg2: memref<27x32xbf16, #tpu.memory_space<vmem>>, %arg3: memref<1x32xf32, #tpu.memory_space<vmem>>, %arg4: memref<512x32xbf16, #tpu.memory_space<vmem>>) attributes {dimension_semantics = [#tpu.dimension_semantics<parallel>], iteration_bounds = array<i64: 1>, scalar_prefetch = 0 : i64, scratch_operands = 0 : i64, tpu.core_type = #tpu.core_type<tc>, window_params = [{transform_indices = @transform_0, window_bounds = array<i64: 512, 27>}, {pipeline_mode = #tpu.pipeline_mode<synchronous>, transform_indices = @transform_1, window_bounds = array<i64: 27, 32>}, {pipeline_mode = #tpu.pipeline_mode<synchronous>, transform_indices = @transform_2, window_bounds = array<i64: 1, 32>}, {transform_indices = @transform_3, window_bounds = array<i64: 512, 32>}]} {
    %c0 = arith.constant 0 : index
    %c0_0 = arith.constant 0 : index
    %0 = vector.load %arg1[%c0, %c0_0] : memref<512x27xbf16, #tpu.memory_space<vmem>>, vector<512x27xbf16>
    %c0_1 = arith.constant 0 : index
    %c0_2 = arith.constant 0 : index
    %1 = vector.load %arg2[%c0_1, %c0_2] : memref<27x32xbf16, #tpu.memory_space<vmem>>, vector<27x32xbf16>
    %cst = arith.constant dense<0.000000e+00> : vector<512x32xf32>
    %2 = tpu.matmul %0, %1, %cst {dimension_numbers = #tpu.dot_dimension_numbers<[1], [0], [0], [1], [0, 0, 1, 1], [], []>} : vector<512x27xbf16>, vector<27x32xbf16>, vector<512x32xf32> -> vector<512x32xf32>
    %c0_3 = arith.constant 0 : index
    %c0_4 = arith.constant 0 : index
    %3 = vector.load %arg3[%c0_3, %c0_4] : memref<1x32xf32, #tpu.memory_space<vmem>>, vector<1x32xf32>
    %4 = vector.broadcast %3 : vector<1x32xf32> to vector<512x32xf32>
    %5 = arith.addf %2, %4 : vector<512x32xf32>
    %6 = arith.negf %5 : vector<512x32xf32>
    %7 = math.exp %6 : vector<512x32xf32>
    %cst_5 = arith.constant 1.000000e+00 : f32
    %8 = vector.broadcast %cst_5 : f32 to vector<512x32xf32>
    %9 = arith.addf %8, %7 : vector<512x32xf32>
    %10 = arith.divf %8, %9 : vector<512x32xf32>
    %11 = arith.mulf %5, %10 : vector<512x32xf32>
    %12 = arith.truncf %11 : vector<512x32xf32> to vector<512x32xbf16>
    %c0_6 = arith.constant 0 : index
    %c0_7 = arith.constant 0 : index
    %13 = vector.load %arg4[%c0_6, %c0_7] : memref<512x32xbf16, #tpu.memory_space<vmem>>, vector<512x32xbf16>
    tpu.vector_store %arg4[%c0_6, %c0_7], %12 {strides = array<i32>} : memref<512x32xbf16, #tpu.memory_space<vmem>>, vector<512x32xbf16>,
    return
  }
  func.func @transform_0(%arg0: i32) -> (i32, i32) {
    %c0_i32 = arith.constant 0 : i32
    %c0_i32_0 = arith.constant 0 : i32
    return %arg0, %c0_i32 : i32, i32
  }
  func.func @transform_1(%arg0: i32) -> (i32, i32) {
    %c0_i32 = arith.constant 0 : i32
    %c0_i32_0 = arith.constant 0 : i32
    %c0_i32_1 = arith.constant 0 : i32
    return %c0_i32, %c0_i32_0 : i32, i32
  }
  func.func @transform_2(%arg0: i32) -> (i32, i32) {
    %c0_i32 = arith.constant 0 : i32
    %c0_i32_0 = arith.constant 0 : i32
    %c0_i32_1 = arith.constant 0 : i32
    return %c0_i32, %c0_i32_0 : i32, i32
  }
  func.func @transform_3(%arg0: i32) -> (i32, i32) {
    %c0_i32 = arith.constant 0 : i32
    %c0_i32_0 = arith.constant 0 : i32
    return %arg0, %c0_i32 : i32, i32
  }
}

</mosaic_0001>

<bundles_post_ra>
// kernel: tpu_custom_call.1
= control target key start
LH: loop header
LB: loop body
LE: loop exit
PB: predicated region body
PF: predicated region fallthrough
CT: control target
= control target key end

     0   :  { %vm358_vm0 = vcmask 1044480   ;;  %vm359_vm1 = vcmask 1045504   ;;  %vm261_vm2 = vcmask 220160   ;;  %v2084_v1 = vmov 65535   ;;  %s2931_s1 = inlined_call_operand.vmem [shape: bf16[27,32], index: 1, kind: input, shape index: {}]   ;;  %s2932_s0 = inlined_call_operand.vmem [shape: bf16[512,27], index: 0, kind: input, shape index: {}]   ;;  %s2933_s2 = inlined_call_operand.vmem [shape: f32[1,32], index: 2, kind: input, shape index: {}]   ;;  %s2934_s3 = inlined_call_operand.vmem [shape: bf16[512,32], index: 3, kind: output, shape index: {}]  }
   0x1   :  { %v1793_v0 = vld [vmem:[%s2931_s1] sm:$0xff]   ;;  %v360_v2 = vsel %vm358_vm0, 4294967295, %v2084_v1  ;;  %v1794_v3 = vld [vmem:[%s2931_s1 + $0x8] sm:$0x3f]   ;;  %v1799_v10 = vld [vmem:[%s2932_s0 + $0x10] sm:$0xff]   ;;  %vm1358_vm3 = vcmask 257024  }
   0x2   :  { %1720 = vmatprep.subr.bf16.mxu0 %v1793_v0  ;;  %1788 = vmatprep.subr.bf16.mxu1 %v1793_v0  ;;  %v361_v4 = vsel %vm359_vm1, %v360_v2, 0  ;;  %v1795_v5 = vld [vmem:[%s2932_s0] sm:$0xff]   ;;  %v1797_v8 = vld [vmem:[%s2932_s0 + $0x8] sm:$0xff]   ;;  %v1800_v11 = vld [vmem:[%s2932_s0 + $0x90] sm:$0xff]  }
   0x3   :  { %1721 = vmatpush3.bf16.msra.mxu0 %v1793_v0  ;;  %1790 = vmatpush3.bf16.msra.mxu1 %v1793_v0  ;;  %v363_v6 = vand.u32 %v1794_v3, %v361_v4  ;;  %v1796_v7 = vld [vmem:[%s2932_s0 + $0x80] sm:$0xff]   ;;  %v1798_v9 = vld [vmem:[%s2932_s0 + $0x88] sm:$0xff]   ;;  %v1801_v12 = vld [vmem:[%s2932_s0 + $0x18] sm:$0xff]  }
   0x4   :  { %1724 = vmatprep.mubr.msk.bf16.mxu0 %vm261_vm2, %v1795_v5  ;;  %1756 = vmatprep.mubr.msk.bf16.mxu1 %vm261_vm2, %v1796_v7  ;;  %v1802_v13 = vld [vmem:[%s2932_s0 + $0x98] sm:$0xff]   ;;  %v1803_v14 = vld [vmem:[%s2932_s0 + $0x20] sm:$0xff]   ;;  %v1805_v16 = vld [vmem:[%s2932_s0 + $0x28] sm:$0xff]  }
   0x5   :  { %1722 = vmatprep.subr.bf16.mxu0 %v363_v6  ;;  %1789 = vmatprep.subr.bf16.mxu1 %v363_v6  ;;  %v1804_v15 = vld [vmem:[%s2932_s0 + $0xa0] sm:$0xff]   ;;  %v1806_v17 = vld [vmem:[%s2932_s0 + $0xa8] sm:$0xff]   ;;  %v1807_v18 = vld [vmem:[%s2932_s0 + $0x30] sm:$0xff]  }
   0x6   :  { %v1808_v19 = vld [vmem:[%s2932_s0 + $0xb0] sm:$0xff]   ;;  %v1809_v20 = vld [vmem:[%s2932_s0 + $0x38] sm:$0xff]   ;;  %v1811_v22 = vld [vmem:[%s2932_s0 + $0x40] sm:$0xff]  }
   0x7   :  { %1723 = vmatpush3.bf16.msra.mxu0 %v363_v6  ;;  %1791 = vmatpush3.bf16.msra.mxu1 %v363_v6  ;;  %v1810_v21 = vld [vmem:[%s2932_s0 + $0xb8] sm:$0xff]   ;;  %v1812_v23 = vld [vmem:[%s2932_s0 + $0xc0] sm:$0xff]   ;;  %v1813_v24 = vld [vmem:[%s2932_s0 + $0x48] sm:$0xff]  }
   0x8   :  { %v1814_v25 = vld [vmem:[%s2932_s0 + $0xc8] sm:$0xff]   ;;  %v1815_v26 = vld [vmem:[%s2932_s0 + $0x50] sm:$0xff]   ;;  %v1817_v28 = vld [vmem:[%s2932_s0 + $0x58] sm:$0xff]  }
   0x9   :  { %v1816_v27 = vld [vmem:[%s2932_s0 + $0xd0] sm:$0xff]   ;;  %v1818_v29 = vld [vmem:[%s2932_s0 + $0xd8] sm:$0xff]   ;;  %v1819_v30 = vld [vmem:[%s2932_s0 + $0x60] sm:$0xff]  }
   0xa   :  { %1725 = vmatmul.mubr.msk.bf16.vlgmr.msra.gmra.mrb[0].mxu0 %vm261_vm2, %v1797_v8  ;;  %1757 = vmatmul.mubr.msk.bf16.vlgmr.msra.gmra.mrb[0].mxu1 %vm261_vm2, %v1798_v9  ;;  %v1820_v31 = vld [vmem:[%s2932_s0 + $0xe0] sm:$0xff]   ;;  %v1821_v32 = vld [vmem:[%s2932_s0 + $0x68] sm:$0xff]   ;;  %v1823_v34 = vld [vmem:[%s2932_s0 + $0x70] sm:$0xff]  }
   0xb   :  { %1728 = vmatprep.mubr.msk.bf16.mxu0 %vm261_vm2, %v1799_v10  ;;  %1760 = vmatprep.mubr.msk.bf16.mxu1 %vm261_vm2, %v1800_v11  ;;  %v1822_v33 = vld [vmem:[%s2932_s0 + $0xe8] sm:$0xff]   ;;  %v1824_v35 = vld [vmem:[%s2932_s0 + $0xf0] sm:$0xff]   ;;  %v1825_v36 = vld [vmem:[%s2932_s0 + $0x78] sm:$0xff]  }
   0xc   :  { %v1826_v37 = vld [vmem:[%s2932_s0 + $0xf8] sm:$0xff]   ;;  %v2242_v38 = vld [vmem:[%s2933_s2] ss:$0 sm:$0xff] }
  0x12   :  { %1729 = vmatmul.mubr.msk.bf16.gmra.mrb[4].mxu0 %vm261_vm2, %v1801_v12  ;;  %1761 = vmatmul.mubr.msk.bf16.gmra.mrb[4].mxu1 %vm261_vm2, %v1802_v13 }
  0x13   :  { %1732 = vmatprep.mubr.msk.bf16.mxu0 %vm261_vm2, %v1803_v14  ;;  %1764 = vmatprep.mubr.msk.bf16.mxu1 %vm261_vm2, %v1804_v15 }
  0x1a   :  { %1733 = vmatmul.mubr.msk.bf16.gmra.mrb[8].mxu0 %vm261_vm2, %v1805_v16  ;;  %1765 = vmatmul.mubr.msk.bf16.gmra.mrb[8].mxu1 %vm261_vm2, %v1806_v17 }
  0x1b   :  { %1736 = vmatprep.mubr.msk.bf16.mxu0 %vm261_vm2, %v1807_v18  ;;  %1768 = vmatprep.mubr.msk.bf16.mxu1 %vm261_vm2, %v1808_v19 }
  0x22   :  { %1737 = vmatmul.mubr.msk.bf16.gmra.mrb[12].mxu0 %vm261_vm2, %v1809_v20  ;;  %1769 = vmatmul.mubr.msk.bf16.gmra.mrb[12].mxu1 %vm261_vm2, %v1810_v21 }
  0x23   :  { %1740 = vmatprep.mubr.msk.bf16.mxu0 %vm261_vm2, %v1811_v22  ;;  %1772 = vmatprep.mubr.msk.bf16.mxu1 %vm261_vm2, %v1812_v23 }
  0x2a   :  { %1741 = vmatmul.mubr.msk.bf16.gmra.mrb[16].mxu0 %vm261_vm2, %v1813_v24  ;;  %1773 = vmatmul.mubr.msk.bf16.gmra.mrb[16].mxu1 %vm261_vm2, %v1814_v25 }
  0x2b   :  { %1744 = vmatprep.mubr.msk.bf16.mxu0 %vm261_vm2, %v1815_v26  ;;  %1776 = vmatprep.mubr.msk.bf16.mxu1 %vm261_vm2, %v1816_v27 }
  0x32   :  { %1745 = vmatmul.mubr.msk.bf16.gmra.mrb[20].mxu0 %vm261_vm2, %v1817_v28  ;;  %1777 = vmatmul.mubr.msk.bf16.gmra.mrb[20].mxu1 %vm261_vm2, %v1818_v29 }
  0x33   :  { %1748 = vmatprep.mubr.msk.bf16.mxu0 %vm261_vm2, %v1819_v30  ;;  %1780 = vmatprep.mubr.msk.bf16.mxu1 %vm261_vm2, %v1820_v31 }
  0x3a   :  { %1749 = vmatmul.mubr.msk.bf16.gmra.mrb[24].mxu0 %vm261_vm2, %v1821_v32  ;;  %1781 = vmatmul.mubr.msk.bf16.gmra.mrb[24].mxu1 %vm261_vm2, %v1822_v33 }
  0x3b   :  { %1752 = vmatprep.mubr.msk.bf16.mxu0 %vm261_vm2, %v1823_v34  ;;  %1784 = vmatprep.mubr.msk.bf16.mxu1 %vm261_vm2, %v1824_v35 }
  0x42   :  { %1753 = vmatmul.mubr.msk.bf16.gmra.mrb[28].mxu0 %vm261_vm2, %v1825_v36  ;;  %1785 = vmatmul.mubr.msk.bf16.gmra.mrb[28].mxu1 %vm261_vm2, %v1826_v37 }
  0xdd   :  { %v1726_v39 = vpop.f32.mrb[0].mxu0  ;;  %v1758_v40 = vpop.f32.mrb[0].mxu1 }
  0xde   :  { %v2245_v41 = vadd.f32 %v1726_v39, %v2242_v38  ;;  %v2248_v42 = vadd.f32 %v1758_v40, %v2242_v38  ;;  %v399_v43 = vpop.f32.mrb[1].mxu0  ;;  %v527_v44 = vpop.f32.mrb[1].mxu1 }
  0xdf   :  { %v2251_v45 = vadd.f32 %v2242_v38, %v399_v43  ;;  %v2254_v46 = vadd.f32 %v2242_v38, %v527_v44  ;;  %v1727_v47 = vpop.f32.mrb[2].mxu0  ;;  %v1759_v48 = vpop.f32.mrb[2].mxu1 }
  0xe0   :  { %v1496_v49 = vmul.f32 -1.442695, %v2245_v41  ;;  %v1528_v50 = vmul.f32 -1.442695, %v2248_v42  ;;  %v2259_v51 = vadd.f32 %v1727_v47, %v2242_v38  ;;  %v2262_v52 = vadd.f32 %v1759_v48, %v2242_v38  ;;  %v402_v53 = vpop.f32.mrb[3].mxu0  ;;  %v530_v54 = vpop.f32.mrb[3].mxu1 }
  0xe1   :  { %v1494_v55 = vmul.f32 -1.442695, %v2251_v45  ;;  %v1526_v56 = vmul.f32 -1.442695, %v2254_v46  ;;  %v2267_v57 = vadd.f32 %v2242_v38, %v402_v53  ;;  %v2270_v58 = vadd.f32 %v2242_v38, %v530_v54 }
  0xe2   :  { %1827 = vpow2.f32 %v1496_v49  ;;  %v1497_v59 = vmul.f32 -1.442695, %v2259_v51  ;;  %v1529_v60 = vmul.f32 -1.442695, %v2262_v52 }
  0xe3   :  { %1829 = vpow2.f32 %v1528_v50  ;;  %v1495_v61 = vmul.f32 -1.442695, %v2267_v57  ;;  %v1527_v62 = vmul.f32 -1.442695, %v2270_v58 }
  0xe4   :  { %1831 = vpow2.f32 %v1494_v55 }
  0xe5   :  { %1833 = vpow2.f32 %v1526_v56  ;;  %v1730_v63 = vpop.f32.mrb[4].mxu0  ;;  %v1762_v0 = vpop.f32.mrb[4].mxu1 }
  0xe6   :  { %1835 = vpow2.f32 %v1497_v59  ;;  %v2277_v1 = vadd.f32 %v1730_v63, %v2242_v38  ;;  %v2280_v2 = vadd.f32 %v1762_v0, %v2242_v38  ;;  %v415_v3 = vpop.f32.mrb[5].mxu0  ;;  %v543_v4 = vpop.f32.mrb[5].mxu1 }
  0xe7   :  { %1837 = vpow2.f32 %v1529_v60  ;;  %v2283_v5 = vadd.f32 %v2242_v38, %v415_v3  ;;  %v2286_v6 = vadd.f32 %v2242_v38, %v543_v4  ;;  %v1731_v7 = vpop.f32.mrb[6].mxu0  ;;  %v1763_v8 = vpop.f32.mrb[6].mxu1 }
  0xe8   :  { %1839 = vpow2.f32 %v1495_v61  ;;  %v1500_v9 = vmul.f32 -1.442695, %v2277_v1  ;;  %v1532_v10 = vmul.f32 -1.442695, %v2280_v2  ;;  %v2291_v11 = vadd.f32 %v1731_v7, %v2242_v38  ;;  %v418_v12 = vpop.f32.mrb[7].mxu0  ;;  %v546_v13 = vpop.f32.mrb[7].mxu1 }
  0xe9   :  { %1841 = vpow2.f32 %v1527_v62  ;;  %v1498_v14 = vmul.f32 -1.442695, %v2283_v5  ;;  %v1530_v15 = vmul.f32 -1.442695, %v2286_v6  ;;  %v2297_v35 = vadd.f32 %v1763_v8, %v2242_v38 }
  0xea   :  { %1843 = vpow2.f32 %v1500_v9  ;;  %v1501_v16 = vmul.f32 -1.442695, %v2291_v11  ;;  %v2300_v40 = vadd.f32 %v2242_v38, %v418_v12  ;;  %v2303_v47 = vadd.f32 %v2242_v38, %v546_v13 }
  0xeb   :  { %1845 = vpow2.f32 %v1532_v10  ;;  %v1533_v55 = vmul.f32 -1.442695, %v2297_v35 }
  0xec   :  { %v1828_v17 = vpop.eup %1827  ;;  %1847 = vpow2.f32 %v1498_v14  ;;  %v1499_v62 = vmul.f32 -1.442695, %v2300_v40  ;;  %v1531_v8 = vmul.f32 -1.442695, %v2303_v47 }
  0xed   :  { %v1830_v18 = vpop.eup %1829  ;;  %v848_v19 = vadd.f32 1.0, %v1828_v17  ;;  %1849 = vpow2.f32 %v1530_v15  ;;  %v1734_v20 = vpop.f32.mrb[8].mxu0 }
  0xee   :  { %v1766_v21 = vpop.f32.mrb[8].mxu1  ;;  %v1832_v22 = vpop.eup %1831  ;;  %v880_v23 = vadd.f32 1.0, %v1830_v18  ;;  %1851 = vpow2.f32 %v1501_v16  ;;  %v2306_v50 = vadd.f32 %v1734_v20, %v2242_v38 }
  0xef   :  { %v431_v24 = vpop.f32.mrb[9].mxu0  ;;  %v559_v25 = vpop.f32.mrb[9].mxu1  ;;  %1853 = vrcp.f32 %v848_v19  ;;  %v846_v27 = vadd.f32 1.0, %v1832_v22  ;;  %v2310_v56 = vadd.f32 %v1766_v21, %v2242_v38 }
  0xf0   :  { %v1834_v26 = vpop.eup %1833  ;;  %v1735_v28 = vpop.f32.mrb[10].mxu0  ;;  %1855 = vrcp.f32 %v880_v23  ;;  %v2316_v63 = vadd.f32 %v2242_v38, %v431_v24  ;;  %v2324_v9 = vadd.f32 %v2242_v38, %v559_v25  ;;  %v1504_v15 = vmul.f32 -1.442695, %v2306_v50 }
  0xf1   :  { %v1767_v29 = vpop.f32.mrb[10].mxu1  ;;  %v1836_v30 = vpop.eup %1835  ;;  %v878_v31 = vadd.f32 1.0, %v1834_v26  ;;  %1857 = vrcp.f32 %v846_v27  ;;  %v1536_v20 = vmul.f32 -1.442695, %v2310_v56  ;;  %v2337_v21 = vadd.f32 %v1735_v28, %v2242_v38 }
  0xf2   :  { %v434_v32 = vpop.f32.mrb[11].mxu0  ;;  %v1838_v33 = vpop.eup %1837  ;;  %v849_v34 = vadd.f32 1.0, %v1836_v30  ;;  %v1502_v25 = vmul.f32 -1.442695, %v2316_v63  ;;  %v2344_v26 = vadd.f32 %v1767_v29, %v2242_v38 }
  0xf3   :  { %v562_v36 = vpop.f32.mrb[11].mxu1  ;;  %v1840_v37 = vpop.eup %1839  ;;  %1859 = vrcp.f32 %v878_v31  ;;  %v881_v39 = vadd.f32 1.0, %v1838_v33  ;;  %v1534_v31 = vmul.f32 -1.442695, %v2324_v9  ;;  %v2349_v28 = vadd.f32 %v2242_v38, %v434_v32 }
  0xf4   :  { %v1842_v43 = vpop.eup %1841  ;;  %1861 = vrcp.f32 %v849_v34  ;;  %v847_v44 = vadd.f32 1.0, %v1840_v37 }
  0xf5   :  { %v1844_v48 = vpop.eup %1843  ;;  %1863 = vrcp.f32 %v881_v39  ;;  %v879_v49 = vadd.f32 1.0, %v1842_v43  ;;  %v2312_v59 = vpop.f32.mrb[12].mxu0 }
  0xf6   :  { %v1846_v53 = vpop.eup %1845  ;;  %1865 = vrcp.f32 %v847_v44  ;;  %v852_v54 = vadd.f32 1.0, %v1844_v48  ;;  %v2318_v0 = vpop.f32.mrb[12].mxu1 }
  0xf7   :  { %v1848_v60 = vpop.eup %1847  ;;  %1867 = vrcp.f32 %v879_v49  ;;  %v884_v61 = vadd.f32 1.0, %v1846_v53  ;;  %v2320_v3 = vpop.f32.mrb[13].mxu0  ;;  %v1537_v49 = vmul.f32 -1.442695, %v2344_v26 }
  0xf8   :  { %v1850_v4 = vpop.eup %1849  ;;  %1869 = vrcp.f32 %v852_v54  ;;  %v850_v7 = vadd.f32 1.0, %v1848_v60  ;;  %v2326_v10 = vpop.f32.mrb[13].mxu1 }
  0xf9   :  { %v2328_v12 = vpop.f32.mrb[14].mxu0  ;;  %v1852_v13 = vpop.eup %1851  ;;  %1871 = vrcp.f32 %v884_v61  ;;  %v882_v14 = vadd.f32 1.0, %v1850_v4 }
  0xfa   :  { %v2331_v16 = vpop.f32.mrb[14].mxu1  ;;  %v2333_v17 = vpop.f32.mrb[15].mxu0  ;;  %1873 = vrcp.f32 %v850_v7  ;;  %v853_v19 = vadd.f32 1.0, %v1852_v13 }
  0xfb   :  { %v1854_v18 = vpop.eup %1853  ;;  %v2339_v22 = vpop.f32.mrb[15].mxu1  ;;  %1875 = vrcp.f32 %v882_v14 }
  0xfc   :  { %v1856_v23 = vpop.eup %1855  ;;  %v1040_v24 = vmul.f32 %v1854_v18, %v2245_v41  ;;  %1877 = vrcp.f32 %v853_v19  ;;  %v2353_v41 = vadd.f32 %v2242_v38, %v562_v36 }
  0xfd   :  { %v1858_v27 = vpop.eup %1857  ;;  %v1072_v30 = vmul.f32 %v1856_v23, %v2248_v42  ;;  %1879 = vpow2.f32 %v1533_v55  ;;  %v1505_v42 = vmul.f32 -1.442695, %v2337_v21  ;;  %v2357_v44 = vpop.f32.mrb[16].mxu0 }
  0xfe   :  { %v1860_v33 = vpop.eup %1859  ;;  %v1624_v34 = vpack.c.bf16 %v1040_v24, %v1040_v24  ;;  %v1038_v37 = vmul.f32 %v1858_v27, %v2251_v45  ;;  %1881 = vpow2.f32 %v1499_v62  ;;  %v2359_v48 = vpop.f32.mrb[16].mxu1  ;;  %v1535_v23 = vmul.f32 -1.442695, %v2353_v41 }
  0xff   :  { %v1862_v39 = vpop.eup %1861  ;;  %v1656_v29 = vpack.c.bf16 %v1072_v30, %v1072_v30  ;;  %v1070_v43 = vmul.f32 %v1860_v33, %v2254_v46  ;;  %1883 = vpow2.f32 %v1531_v8  ;;  %v2367_v46 = vpop.f32.mrb[17].mxu0 }
 0x100   :  { %v1864_v32 = vpop.eup %1863  ;;  %1361 = vst.msk [vmem:[%s2934_s3 + $0x8] sm:$0xf] %vm1358_vm3, %v1624_v34  ;;  %v1622_v45 = vpack.c.bf16 %v1038_v37, %v1038_v37  ;;  %v1041_v36 = vmul.f32 %v1862_v39, %v2259_v51  ;;  %v2369_v53 = vpop.f32.mrb[17].mxu1  ;;  %1885 = vpow2.f32 %v1504_v15  ;;  %v2378_v51 = vadd.f32 %v2312_v59, %v2242_v38 }
 0x101   :  { %v1866_v54 = vpop.eup %1865  ;;  %1393 = vst.msk [vmem:[%s2934_s3 + $0x88] sm:$0xf] %vm1358_vm3, %v1656_v29  ;;  %v1654_v55 = vpack.c.bf16 %v1070_v43, %v1070_v43  ;;  %v1073_v60 = vmul.f32 %v1864_v32, %v2262_v52  ;;  %v2380_v61 = vpop.f32.mrb[18].mxu0  ;;  %1887 = vpow2.f32 %v1536_v20  ;;  %v2391_v52 = vadd.f32 %v2318_v0, %v2242_v38 }
 0x102   :  { %v2382_v62 = vpop.f32.mrb[18].mxu1  ;;  %v1868_v4 = vpop.eup %1867  ;;  %1359 = vst.msk [vmem:[%s2934_s3] sm:$0xf] %vm1358_vm3, %v1622_v45  ;;  %v1625_v7 = vpack.c.bf16 %v1041_v36, %v1041_v36  ;;  %v1039_v8 = vmul.f32 %v1866_v54, %v2267_v57  ;;  %1889 = vpow2.f32 %v1502_v25  ;;  %v1503_v57 = vmul.f32 -1.442695, %v2349_v28 }
 0x103   :  { %v2393_v59 = vpop.f32.mrb[19].mxu0  ;;  %v2395_v13 = vpop.f32.mrb[19].mxu1  ;;  %1391 = vst.msk [vmem:[%s2934_s3 + $0x80] sm:$0xf] %vm1358_vm3, %v1654_v55  ;;  %v1657_v15 = vpack.c.bf16 %v1073_v60, %v1073_v60  ;;  %v1071_v18 = vmul.f32 %v1868_v4, %v2270_v58  ;;  %1891 = vpow2.f32 %v1534_v31  ;;  %v1508_v27 = vmul.f32 -1.442695, %v2378_v51 }
 0x104   :  { %v1870_v14 = vpop.eup %1869  ;;  %1362 = vst.msk [vmem:[%s2934_s3 + $0xc] sm:$0xf] %vm1358_vm3, %v1625_v7  ;;  %v1623_v0 = vpack.c.bf16 %v1039_v8, %v1039_v8  ;;  %1893 = vpow2.f32 %v1505_v42  ;;  %v1540_v33 = vmul.f32 -1.442695, %v2391_v52 }
 0x105   :  { %v1872_v19 = vpop.eup %1871  ;;  %v1044_v20 = vmul.f32 %v1870_v14, %v2277_v1  ;;  %1394 = vst.msk [vmem:[%s2934_s3 + $0x8c] sm:$0xf] %vm1358_vm3, %v1657_v15  ;;  %v1655_v58 = vpack.c.bf16 %v1071_v18, %v1071_v18  ;;  %1895 = vpow2.f32 %v1537_v49  ;;  %v2426_v39 = vpop.f32.mrb[20].mxu0 }
 0x106   :  { %v1874_v24 = vpop.eup %1873  ;;  %v1076_v25 = vmul.f32 %v1872_v19, %v2280_v2  ;;  %1360 = vst.msk [vmem:[%s2934_s3 + $0x4] sm:$0xf] %vm1358_vm3, %v1623_v0  ;;  %1897 = vpow2.f32 %v1503_v57  ;;  %v2428_v29 = vpop.f32.mrb[20].mxu1  ;;  %v2465_v19 = vadd.f32 %v2242_v38, %v2320_v3  ;;  %v2474_v3 = vadd.f32 %v2242_v38, %v2326_v10 }
 0x107   :  { %v1876_v30 = vpop.eup %1875  ;;  %v1628_v1 = vpack.c.bf16 %v1044_v20, %v1044_v20  ;;  %v1042_v31 = vmul.f32 %v1874_v24, %v2283_v5  ;;  %1392 = vst.msk [vmem:[%s2934_s3 + $0x84] sm:$0xf] %vm1358_vm3, %v1655_v58  ;;  %1899 = vpow2.f32 %v1535_v23  ;;  %v2435_v32 = vpop.f32.mrb[21].mxu0 }
 0x108   :  { %v1878_v34 = vpop.eup %1877  ;;  %v1660_v2 = vpack.c.bf16 %v1076_v25, %v1076_v25  ;;  %v1074_v37 = vmul.f32 %v1876_v30, %v2286_v6  ;;  %v2437_v45 = vpop.f32.mrb[21].mxu1  ;;  %1901 = vpow2.f32 %v1508_v27 }
 0x109   :  { %v1880_v43 = vpop.eup %1879  ;;  %1365 = vst.msk [vmem:[%s2934_s3 + $0x18] sm:$0xf] %vm1358_vm3, %v1628_v1  ;;  %v1626_v5 = vpack.c.bf16 %v1042_v31, %v1042_v31  ;;  %v1045_v42 = vmul.f32 %v1878_v34, %v2291_v11  ;;  %v2443_v54 = vpop.f32.mrb[22].mxu0  ;;  %1903 = vpow2.f32 %v1540_v33  ;;  %v1506_v33 = vmul.f32 -1.442695, %v2465_v19 }
 0x10a   :  { %v1882_v6 = vpop.eup %1881  ;;  %1397 = vst.msk [vmem:[%s2934_s3 + $0x98] sm:$0xf] %vm1358_vm3, %v1660_v2  ;;  %v1658_v36 = vpack.c.bf16 %v1074_v37, %v1074_v37  ;;  %v885_v49 = vadd.f32 1.0, %v1880_v43  ;;  %v2445_v55 = vpop.f32.mrb[22].mxu1 }
 0x10b   :  { %v1884_v60 = vpop.eup %1883  ;;  %1363 = vst.msk [vmem:[%s2934_s3 + $0x10] sm:$0xf] %vm1358_vm3, %v1626_v5  ;;  %v1629_v11 = vpack.c.bf16 %v1045_v42, %v1045_v42  ;;  %v851_v4 = vadd.f32 1.0, %v1882_v6  ;;  %v2451_v7 = vpop.f32.mrb[23].mxu0  ;;  %v2482_v5 = vadd.f32 %v2328_v12, %v2242_v38  ;;  %v2486_v42 = vadd.f32 %v2331_v16, %v2242_v38 }
 0x10c   :  { %v2453_v8 = vpop.f32.mrb[23].mxu1  ;;  %v1886_v14 = vpop.eup %1885  ;;  %1395 = vst.msk [vmem:[%s2934_s3 + $0x90] sm:$0xf] %vm1358_vm3, %v1658_v36  ;;  %1905 = vrcp.f32 %v885_v49  ;;  %v883_v15 = vadd.f32 1.0, %v1884_v60  ;;  %v2494_v60 = vadd.f32 %v2242_v38, %v2333_v17 }
 0x10d   :  { %v1888_v18 = vpop.eup %1887  ;;  %1366 = vst.msk [vmem:[%s2934_s3 + $0x1c] sm:$0xf] %vm1358_vm3, %v1629_v11  ;;  %1907 = vrcp.f32 %v851_v4  ;;  %v856_v57 = vadd.f32 1.0, %v1886_v14  ;;  %v2467_v27 = vpop.f32.mrb[24].mxu0  ;;  %v2498_v11 = vadd.f32 %v2242_v38, %v2339_v22  ;;  %v1538_v22 = vmul.f32 -1.442695, %v2474_v3 }
 0x10e   :  { %v1890_v0 = vpop.eup %1889  ;;  %1909 = vrcp.f32 %v883_v15  ;;  %v888_v20 = vadd.f32 1.0, %v1888_v18  ;;  %v2469_v30 = vpop.f32.mrb[24].mxu1  ;;  %v2506_v15 = vadd.f32 %v2357_v44, %v2242_v38  ;;  %v2510_v18 = vadd.f32 %v2359_v48, %v2242_v38 }
 0x10f   :  { %v1892_v23 = vpop.eup %1891  ;;  %1911 = vrcp.f32 %v856_v57  ;;  %v854_v24 = vadd.f32 1.0, %v1890_v0  ;;  %v2476_v34 = vpop.f32.mrb[25].mxu0  ;;  %v2515_v0 = vadd.f32 %v2242_v38, %v2367_v46  ;;  %v1541_v44 = vmul.f32 -1.442695, %v2486_v42 }
 0x110   :  { %v1894_v58 = vpop.eup %1893  ;;  %1913 = vrcp.f32 %v888_v20  ;;  %v886_v25 = vadd.f32 1.0, %v1892_v23  ;;  %v2478_v2 = vpop.f32.mrb[25].mxu1  ;;  %v1512_v46 = vmul.f32 -1.442695, %v2506_v15 }
 0x111   :  { %v1896_v1 = vpop.eup %1895  ;;  %1915 = vrcp.f32 %v854_v24  ;;  %v857_v31 = vadd.f32 1.0, %v1894_v58  ;;  %v2488_v6 = vpop.f32.mrb[26].mxu0  ;;  %v1509_v24 = vmul.f32 -1.442695, %v2482_v5 }
 0x112   :  { %v1898_v37 = vpop.eup %1897  ;;  %1917 = vrcp.f32 %v886_v25  ;;  %v889_v43 = vadd.f32 1.0, %v1896_v1  ;;  %v2490_v36 = vpop.f32.mrb[26].mxu1  ;;  %v1507_v25 = vmul.f32 -1.442695, %v2494_v60  ;;  %v1539_v1 = vmul.f32 -1.442695, %v2498_v11 }
 0x113   :  { %v1900_v10 = vpop.eup %1899  ;;  %1919 = vrcp.f32 %v857_v31  ;;  %v855_v49 = vadd.f32 1.0, %v1898_v37  ;;  %v2500_v12 = vpop.f32.mrb[27].mxu0 }
 0x114   :  { %v2502_v4 = vpop.f32.mrb[27].mxu1  ;;  %v1902_v16 = vpop.eup %1901  ;;  %1921 = vrcp.f32 %v889_v43  ;;  %v887_v14 = vadd.f32 1.0, %v1900_v10  ;;  %v1544_v43 = vmul.f32 -1.442695, %v2510_v18 }
 0x115   :  { %v1904_v17 = vpop.eup %1903  ;;  %1923 = vrcp.f32 %v855_v49  ;;  %v860_v57 = vadd.f32 1.0, %v1902_v16  ;;  %v2525_v10 = vpop.f32.mrb[28].mxu0 }
 0x116   :  { %v1906_v20 = vpop.eup %1905  ;;  %1925 = vrcp.f32 %v887_v14  ;;  %v892_v23 = vadd.f32 1.0, %v1904_v17  ;;  %2935 = vst [vmem:[#allocation2_spill] sm:$0xff] %v2525_v10  ;;  %v2527_v49 = vpop.f32.mrb[28].mxu1  ;;  %v1510_v17 = vmul.f32 -1.442695, %v2515_v0  ;;  %v2538_v10 = vadd.f32 %v2242_v38, %v2369_v53 }
 0x117   :  { %v1908_v58 = vpop.eup %1907  ;;  %v1077_v48 = vmul.f32 %v1906_v20, %v2297_v35  ;;  %1927 = vrcp.f32 %v860_v57  ;;  %2936 = vst [vmem:[#allocation3_spill] sm:$0xff] %v2527_v49  ;;  %v2531_v57 = vpop.f32.mrb[29].mxu0 }
 0x118   :  { %v1910_v31 = vpop.eup %1909  ;;  %v1043_v37 = vmul.f32 %v1908_v58, %v2300_v40  ;;  %1929 = vrcp.f32 %v892_v23  ;;  %v2533_v20 = vpop.f32.mrb[29].mxu1 }
 0x119   :  { %v1912_v16 = vpop.eup %1911  ;;  %v1661_v14 = vpack.c.bf16 %v1077_v48, %v1077_v48  ;;  %v1075_v35 = vmul.f32 %v1910_v31, %v2303_v47  ;;  %1931 = vpow2.f32 %v1506_v33  ;;  %v2540_v49 = vpop.f32.mrb[30].mxu0 }
 0x11a   :  { %v1914_v40 = vpop.eup %1913  ;;  %v1627_v23 = vpack.c.bf16 %v1043_v37, %v1043_v37  ;;  %v1048_v58 = vmul.f32 %v1912_v16, %v2306_v50  ;;  %1933 = vpow2.f32 %v1538_v22  ;;  %v2542_v48 = vpop.f32.mrb[30].mxu1  ;;  %v2551_v50 = vadd.f32 %v2380_v61, %v2242_v38 }
 0x11b   :  { %v1916_v47 = vpop.eup %1915  ;;  %1398 = vst.msk [vmem:[%s2934_s3 + $0x9c] sm:$0xf] %vm1358_vm3, %v1661_v14  ;;  %v1659_v33 = vpack.c.bf16 %v1075_v35, %v1075_v35  ;;  %v1080_v31 = vmul.f32 %v1914_v40, %v2310_v56  ;;  %1935 = vpow2.f32 %v1509_v24  ;;  %v2553_v53 = vpop.f32.mrb[31].mxu0  ;;  %v2564_v56 = vadd.f32 %v2382_v62, %v2242_v38 }
 0x11c   :  { %v2555_v22 = vpop.f32.mrb[31].mxu1  ;;  %v1918_v37 = vpop.eup %1917  ;;  %1364 = vst.msk [vmem:[%s2934_s3 + $0x14] sm:$0xf] %vm1358_vm3, %v1627_v23  ;;  %v1632_v16 = vpack.c.bf16 %v1048_v58, %v1048_v58  ;;  %v1046_v14 = vmul.f32 %v1916_v47, %v2316_v63  ;;  %1937 = vpow2.f32 %v1541_v44  ;;  %v2573_v40 = vadd.f32 %v2242_v38, %v2393_v59 }
 0x11d   :  { %v1920_v61 = vpop.eup %1919  ;;  %1396 = vst.msk [vmem:[%s2934_s3 + $0x94] sm:$0xf] %vm1358_vm3, %v1659_v33  ;;  %v1664_v24 = vpack.c.bf16 %v1080_v31, %v1080_v31  ;;  %v1078_v35 = vmul.f32 %v1918_v37, %v2324_v9  ;;  %1939 = vpow2.f32 %v1507_v25  ;;  %v1542_v23 = vmul.f32 -1.442695, %v2538_v10 }
 0x11e   :  { %v1922_v63 = vpop.eup %1921  ;;  %1369 = vst.msk [vmem:[%s2934_s3 + $0x28] sm:$0xf] %vm1358_vm3, %v1632_v16  ;;  %v1630_v62 = vpack.c.bf16 %v1046_v14, %v1046_v14  ;;  %v1049_v44 = vmul.f32 %v1920_v61, %v2337_v21  ;;  %1941 = vpow2.f32 %v1539_v1  ;;  %v1513_v25 = vmul.f32 -1.442695, %v2551_v50 }
 0x11f   :  { %v1924_v58 = vpop.eup %1923  ;;  %1401 = vst.msk [vmem:[%s2934_s3 + $0xa8] sm:$0xf] %vm1358_vm3, %v1664_v24  ;;  %v1662_v9 = vpack.c.bf16 %v1078_v35, %v1078_v35  ;;  %v1081_v59 = vmul.f32 %v1922_v63, %v2344_v26  ;;  %1943 = vpow2.f32 %v1512_v46  ;;  %v1545_v33 = vmul.f32 -1.442695, %v2564_v56 }
 0x120   :  { %v1926_v47 = vpop.eup %1925  ;;  %1367 = vst.msk [vmem:[%s2934_s3 + $0x20] sm:$0xf] %vm1358_vm3, %v1630_v62  ;;  %v1633_v21 = vpack.c.bf16 %v1049_v44, %v1049_v44  ;;  %v1047_v1 = vmul.f32 %v1924_v58, %v2349_v28  ;;  %1945 = vpow2.f32 %v1544_v43  ;;  %v1511_v37 = vmul.f32 -1.442695, %v2573_v40 }
 0x121   :  { %v1928_v31 = vpop.eup %1927  ;;  %1399 = vst.msk [vmem:[%s2934_s3 + $0xa0] sm:$0xf] %vm1358_vm3, %v1662_v9  ;;  %v1665_v26 = vpack.c.bf16 %v1081_v59, %v1081_v59  ;;  %v1079_v46 = vmul.f32 %v1926_v47, %v2353_v41  ;;  %1947 = vpow2.f32 %v1510_v17 }
 0x122   :  { %v1930_v16 = vpop.eup %1929  ;;  %1370 = vst.msk [vmem:[%s2934_s3 + $0x2c] sm:$0xf] %vm1358_vm3, %v1633_v21  ;;  %v1631_v28 = vpack.c.bf16 %v1047_v1, %v1047_v1  ;;  %v1052_v43 = vmul.f32 %v1928_v31, %v2378_v51  ;;  %1949 = vpow2.f32 %v1542_v23 }
 0x123   :  { %v1932_v14 = vpop.eup %1931  ;;  %1402 = vst.msk [vmem:[%s2934_s3 + $0xac] sm:$0xf] %vm1358_vm3, %v1665_v26  ;;  %v1663_v41 = vpack.c.bf16 %v1079_v46, %v1079_v46  ;;  %v1084_v17 = vmul.f32 %v1930_v16, %v2391_v52  ;;  %1951 = vpow2.f32 %v1513_v25  ;;  %v2627_v25 = vadd.f32 %v2242_v38, %v2395_v13 }
 0x124   :  { %v1934_v61 = vpop.eup %1933  ;;  %1368 = vst.msk [vmem:[%s2934_s3 + $0x24] sm:$0xf] %vm1358_vm3, %v1631_v28  ;;  %v1636_v24 = vpack.c.bf16 %v1052_v43, %v1052_v43  ;;  %v858_v35 = vadd.f32 1.0, %v1932_v14  ;;  %1953 = vpow2.f32 %v1545_v33  ;;  %v2631_v46 = vadd.f32 %v2426_v39, %v2242_v38 }
 0x125   :  { %v1936_v51 = vpop.eup %1935  ;;  %1400 = vst.msk [vmem:[%s2934_s3 + $0xa4] sm:$0xf] %vm1358_vm3, %v1663_v41  ;;  %v1668_v63 = vpack.c.bf16 %v1084_v17, %v1084_v17  ;;  %v890_v62 = vadd.f32 1.0, %v1934_v61  ;;  %1955 = vpow2.f32 %v1511_v37  ;;  %v2635_v37 = vadd.f32 %v2428_v29, %v2242_v38 }
 0x126   :  { %v1938_v52 = vpop.eup %1937  ;;  %1373 = vst.msk [vmem:[%s2934_s3 + $0x38] sm:$0xf] %vm1358_vm3, %v1636_v24  ;;  %1957 = vrcp.f32 %v858_v35  ;;  %v861_v44 = vadd.f32 1.0, %v1936_v51  ;;  %v1543_v28 = vmul.f32 -1.442695, %v2627_v25  ;;  %v2640_v43 = vadd.f32 %v2242_v38, %v2435_v32 }
 0x127   :  { %v1940_v23 = vpop.eup %1939  ;;  %1405 = vst.msk [vmem:[%s2934_s3 + $0xb8] sm:$0xf] %vm1358_vm3, %v1668_v63  ;;  %1959 = vrcp.f32 %v890_v62  ;;  %v893_v58 = vadd.f32 1.0, %v1938_v52  ;;  %v2644_v39 = vadd.f32 %v2242_v38, %v2437_v45  ;;  %v2648_v29 = vadd.f32 %v2443_v54, %v2242_v38 }
 0x128   :  { %v1942_v9 = vpop.eup %1941  ;;  %1961 = vrcp.f32 %v861_v44  ;;  %v859_v59 = vadd.f32 1.0, %v1940_v23  ;;  %v2652_v24 = vadd.f32 %v2445_v55, %v2242_v38  ;;  %v2656_v32 = vadd.f32 %v2242_v38, %v2451_v7 }
 0x129   :  { %v1944_v47 = vpop.eup %1943  ;;  %1963 = vrcp.f32 %v893_v58  ;;  %v891_v21 = vadd.f32 1.0, %v1942_v9  ;;  %v1516_v45 = vmul.f32 -1.442695, %v2631_v46  ;;  %v1548_v63 = vmul.f32 -1.442695, %v2635_v37 }
 0x12a   :  { %v1946_v1 = vpop.eup %1945  ;;  %1965 = vrcp.f32 %v859_v59  ;;  %v864_v33 = vadd.f32 1.0, %v1944_v47  ;;  %v1514_v52 = vmul.f32 -1.442695, %v2640_v43  ;;  %v2663_v55 = vadd.f32 %v2242_v38, %v2453_v8 }
 0x12b   :  { %v1948_v31 = vpop.eup %1947  ;;  %1967 = vrcp.f32 %v891_v21  ;;  %v896_v26 = vadd.f32 1.0, %v1946_v1  ;;  %v1546_v23 = vmul.f32 -1.442695, %v2644_v39  ;;  %v1517_v58 = vmul.f32 -1.442695, %v2648_v29 }
 0x12c   :  { %v1950_v16 = vpop.eup %1949  ;;  %1969 = vrcp.f32 %v864_v33  ;;  %v862_v13 = vadd.f32 1.0, %v1948_v31  ;;  %v1549_v47 = vmul.f32 -1.442695, %v2652_v24  ;;  %v1515_v21 = vmul.f32 -1.442695, %v2656_v32 }
 0x12d   :  { %v1952_v14 = vpop.eup %1951  ;;  %1971 = vrcp.f32 %v896_v26  ;;  %v894_v41 = vadd.f32 1.0, %v1950_v16 }
 0x12e   :  { %v1954_v17 = vpop.eup %1953  ;;  %1973 = vrcp.f32 %v862_v13  ;;  %v865_v61 = vadd.f32 1.0, %v1952_v14 }
 0x12f   :  { %v1956_v35 = vpop.eup %1955  ;;  %1975 = vrcp.f32 %v894_v41  ;;  %v897_v51 = vadd.f32 1.0, %v1954_v17  ;;  %v2694_v17 = vadd.f32 %v2242_v38, %v2476_v34 }
 0x130   :  { %v1958_v54 = vpop.eup %1957  ;;  %1977 = vrcp.f32 %v865_v61  ;;  %v863_v62 = vadd.f32 1.0, %v1956_v35  ;;  %v2703_v35 = vadd.f32 %v2242_v38, %v2478_v2 }
 0x131   :  { %v1960_v44 = vpop.eup %1959  ;;  %v1050_v7 = vmul.f32 %v1958_v54, %v2465_v19  ;;  %1979 = vrcp.f32 %v897_v51  ;;  %v2674_v19 = vadd.f32 %v2467_v27, %v2242_v38  ;;  %v2685_v27 = vadd.f32 %v2469_v30, %v2242_v38 }
 0x132   :  { %v1962_v9 = vpop.eup %1961  ;;  %v1082_v59 = vmul.f32 %v1960_v44, %v2474_v3  ;;  %1981 = vrcp.f32 %v863_v62  ;;  %v1547_v3 = vmul.f32 -1.442695, %v2663_v55 }
 0x133   :  { %v1964_v1 = vpop.eup %1963  ;;  %v1634_v33 = vpack.c.bf16 %v1050_v7, %v1050_v7  ;;  %v1053_v8 = vmul.f32 %v1962_v9, %v2482_v5  ;;  %1983 = vpow2.f32 %v1543_v28 }
 0x134   :  { %v1966_v31 = vpop.eup %1965  ;;  %v1666_v26 = vpack.c.bf16 %v1082_v59, %v1082_v59  ;;  %v1085_v16 = vmul.f32 %v1964_v1, %v2486_v42  ;;  %1985 = vpow2.f32 %v1516_v45  ;;  %v1520_v45 = vmul.f32 -1.442695, %v2674_v19 }
 0x135   :  { %v1968_v13 = vpop.eup %1967  ;;  %1371 = vst.msk [vmem:[%s2934_s3 + $0x30] sm:$0xf] %vm1358_vm3, %v1634_v33  ;;  %v1637_v14 = vpack.c.bf16 %v1053_v8, %v1053_v8  ;;  %v1051_v5 = vmul.f32 %v1966_v31, %v2494_v60  ;;  %1987 = vpow2.f32 %v1548_v63 }
 0x136   :  { %v1970_v28 = vpop.eup %1969  ;;  %1403 = vst.msk [vmem:[%s2934_s3 + $0xb0] sm:$0xf] %vm1358_vm3, %v1666_v26  ;;  %v1669_v42 = vpack.c.bf16 %v1085_v16, %v1085_v16  ;;  %v1083_v41 = vmul.f32 %v1968_v13, %v2498_v11  ;;  %1989 = vpow2.f32 %v1514_v52  ;;  %v1518_v52 = vmul.f32 -1.442695, %v2694_v17 }
 0x137   :  { %v1972_v60 = vpop.eup %1971  ;;  %1374 = vst.msk [vmem:[%s2934_s3 + $0x3c] sm:$0xf] %vm1358_vm3, %v1637_v14  ;;  %v1635_v30 = vpack.c.bf16 %v1051_v5, %v1051_v5  ;;  %v1056_v61 = vmul.f32 %v1970_v28, %v2506_v15  ;;  %1991 = vpow2.f32 %v1546_v23  ;;  %v1552_v15 = vmul.f32 -1.442695, %v2685_v27 }
 0x138   :  { %v1974_v11 = vpop.eup %1973  ;;  %1406 = vst.msk [vmem:[%s2934_s3 + $0xbc] sm:$0xf] %vm1358_vm3, %v1669_v42  ;;  %v1667_v34 = vpack.c.bf16 %v1083_v41, %v1083_v41  ;;  %v1088_v51 = vmul.f32 %v1972_v60, %v2510_v18  ;;  %1993 = vpow2.f32 %v1517_v58  ;;  %v1550_v23 = vmul.f32 -1.442695, %v2703_v35 }
 0x139   :  { %v1976_v63 = vpop.eup %1975  ;;  %1372 = vst.msk [vmem:[%s2934_s3 + $0x34] sm:$0xf] %vm1358_vm3, %v1635_v30  ;;  %v1640_v38 = vpack.c.bf16 %v1056_v61, %v1056_v61  ;;  %v1054_v2 = vmul.f32 %v1974_v11, %v2515_v0  ;;  %1995 = vpow2.f32 %v1549_v47  ;;  %v2083_v61 = vld [vmem:[%s2933_s2] ss:$0 sm:$0xff] }
 0x13a   :  { %v1978_v54 = vpop.eup %1977  ;;  %1404 = vst.msk [vmem:[%s2934_s3 + $0xb4] sm:$0xf] %vm1358_vm3, %v1667_v34  ;;  %v1672_v18 = vpack.c.bf16 %v1088_v51, %v1088_v51  ;;  %v1086_v62 = vmul.f32 %v1976_v63, %v2538_v10  ;;  %1997 = vpow2.f32 %v1515_v21  ;;  %v2759_v11 = vadd.f32 %v2083_v61, %v2488_v6  ;;  %v2938_v6 = vld [vmem:[#allocation3_spill] sm:$0xff] }
 0x13b   :  { %v1980_v44 = vpop.eup %1979  ;;  %1377 = vst.msk [vmem:[%s2934_s3 + $0x48] sm:$0xf] %vm1358_vm3, %v1640_v38  ;;  %v1638_v0 = vpack.c.bf16 %v1054_v2, %v1054_v2  ;;  %v1057_v7 = vmul.f32 %v1978_v54, %v2551_v50  ;;  %1999 = vpow2.f32 %v1547_v3  ;;  %v2762_v34 = vadd.f32 %v2083_v61, %v2490_v36  ;;  %v2937_v54 = vld [vmem:[#allocation2_spill] sm:$0xff] }
 0x13c   :  { %v1982_v58 = vpop.eup %1981  ;;  %1409 = vst.msk [vmem:[%s2934_s3 + $0xc8] sm:$0xf] %vm1358_vm3, %v1672_v18  ;;  %v1670_v10 = vpack.c.bf16 %v1086_v62, %v1086_v62  ;;  %v1089_v9 = vmul.f32 %v1980_v44, %v2564_v56  ;;  %2001 = vpow2.f32 %v1520_v45  ;;  %v2765_v63 = vadd.f32 %v2083_v61, %v2500_v12 }
 0x13d   :  { %v1984_v59 = vpop.eup %1983  ;;  %1375 = vst.msk [vmem:[%s2934_s3 + $0x40] sm:$0xf] %vm1358_vm3, %v1638_v0  ;;  %v1641_v50 = vpack.c.bf16 %v1057_v7, %v1057_v7  ;;  %v1055_v47 = vmul.f32 %v1982_v58, %v2573_v40  ;;  %2003 = vpow2.f32 %v1552_v15  ;;  %v2768_v38 = vadd.f32 %v2083_v61, %v2502_v4 }
 0x13e   :  { %v1986_v21 = vpop.eup %1985  ;;  %1407 = vst.msk [vmem:[%s2934_s3 + $0xc0] sm:$0xf] %vm1358_vm3, %v1670_v10  ;;  %v1673_v1 = vpack.c.bf16 %v1089_v9, %v1089_v9  ;;  %v895_v33 = vadd.f32 1.0, %v1984_v59  ;;  %2005 = vpow2.f32 %v1518_v52  ;;  %v2771_v18 = vadd.f32 %v2083_v61, %v2937_v54 }
 0x13f   :  { %v1988_v56 = vpop.eup %1987  ;;  %1378 = vst.msk [vmem:[%s2934_s3 + $0x4c] sm:$0xf] %vm1358_vm3, %v1641_v50  ;;  %v1639_v8 = vpack.c.bf16 %v1055_v47, %v1055_v47  ;;  %v868_v31 = vadd.f32 1.0, %v1986_v21  ;;  %2007 = vpow2.f32 %v1550_v23  ;;  %v2774_v62 = vadd.f32 %v2083_v61, %v2938_v6 }
 0x140   :  { %v1990_v40 = vpop.eup %1989  ;;  %1410 = vst.msk [vmem:[%s2934_s3 + $0xcc] sm:$0xf] %vm1358_vm3, %v1673_v1  ;;  %2009 = vrcp.f32 %v895_v33  ;;  %v900_v26 = vadd.f32 1.0, %v1988_v56  ;;  %v2777_v44 = vadd.f32 %v2083_v61, %v2531_v57  ;;  %v2780_v12 = vadd.f32 %v2083_v61, %v2533_v20 }
 0x141   :  { %v1992_v16 = vpop.eup %1991  ;;  %1376 = vst.msk [vmem:[%s2934_s3 + $0x44] sm:$0xf] %vm1358_vm3, %v1639_v8  ;;  %2011 = vrcp.f32 %v868_v31  ;;  %v866_v3 = vadd.f32 1.0, %v1990_v40  ;;  %v1521_v7 = vmul.f32 -1.442695, %v2759_v11 }
 0x142   :  { %v1994_v13 = vpop.eup %1993  ;;  %2013 = vrcp.f32 %v900_v26  ;;  %v898_v14 = vadd.f32 1.0, %v1992_v16  ;;  %v1553_v23 = vmul.f32 -1.442695, %v2762_v34  ;;  %v1519_v9 = vmul.f32 -1.442695, %v2765_v63 }
 0x143   :  { %v1996_v5 = vpop.eup %1995  ;;  %2015 = vrcp.f32 %v866_v3  ;;  %v869_v28 = vadd.f32 1.0, %v1994_v13  ;;  %v1551_v59 = vmul.f32 -1.442695, %v2768_v38  ;;  %v1524_v20 = vmul.f32 -1.442695, %v2771_v18 }
 0x144   :  { %v1998_v42 = vpop.eup %1997  ;;  %2017 = vrcp.f32 %v898_v14  ;;  %v901_v41 = vadd.f32 1.0, %v1996_v5  ;;  %v1556_v47 = vmul.f32 -1.442695, %v2774_v62  ;;  %v1522_v33 = vmul.f32 -1.442695, %v2777_v44 }
 0x145   :  { %v2000_v60 = vpop.eup %1999  ;;  %2019 = vrcp.f32 %v869_v28  ;;  %v867_v30 = vadd.f32 1.0, %v1998_v42  ;;  %v1554_v56 = vmul.f32 -1.442695, %v2780_v12  ;;  %v2814_v28 = vadd.f32 %v2083_v61, %v2555_v22 }
 0x146   :  { %v2002_v51 = vpop.eup %2001  ;;  %2021 = vrcp.f32 %v901_v41  ;;  %v899_v45 = vadd.f32 1.0, %v2000_v60 }
 0x147   :  { %v2004_v2 = vpop.eup %2003  ;;  %2023 = vrcp.f32 %v867_v30  ;;  %v872_v15 = vadd.f32 1.0, %v2002_v51  ;;  %v1555_v54 = vmul.f32 -1.442695, %v2814_v28 }
 0x148   :  { %v2006_v36 = vpop.eup %2005  ;;  %2025 = vrcp.f32 %v899_v45  ;;  %v904_v52 = vadd.f32 1.0, %v2004_v2 }
 0x149   :  { %v2008_v4 = vpop.eup %2007  ;;  %2027 = vrcp.f32 %v872_v15  ;;  %v870_v0 = vadd.f32 1.0, %v2006_v36 }
 0x14a   :  { %v2010_v58 = vpop.eup %2009  ;;  %2029 = vrcp.f32 %v904_v52  ;;  %v902_v10 = vadd.f32 1.0, %v2008_v4 }
 0x14b   :  { %v2012_v50 = vpop.eup %2011  ;;  %v1087_v57 = vmul.f32 %v2010_v58, %v2627_v25  ;;  %2031 = vrcp.f32 %v870_v0  ;;  %v2794_v25 = vadd.f32 %v2083_v61, %v2540_v49  ;;  %v2806_v49 = vadd.f32 %v2083_v61, %v2553_v53 }
 0x14c   :  { %v2014_v21 = vpop.eup %2013  ;;  %v1060_v1 = vmul.f32 %v2012_v50, %v2631_v46  ;;  %2033 = vrcp.f32 %v902_v10  ;;  %v2798_v46 = vadd.f32 %v2083_v61, %v2542_v48 }
 0x14d   :  { %v2016_v8 = vpop.eup %2015  ;;  %v1671_v31 = vpack.c.bf16 %v1087_v57, %v1087_v57  ;;  %v1092_v40 = vmul.f32 %v2014_v21, %v2635_v37  ;;  %2035 = vpow2.f32 %v1521_v7  ;;  %v1525_v41 = vmul.f32 -1.442695, %v2794_v25 }
 0x14e   :  { %v2018_v26 = vpop.eup %2017  ;;  %v1644_v16 = vpack.c.bf16 %v1060_v1, %v1060_v1  ;;  %v1058_v3 = vmul.f32 %v2016_v8, %v2640_v43  ;;  %2037 = vpow2.f32 %v1553_v23  ;;  %v1557_v30 = vmul.f32 -1.442695, %v2798_v46 }
 0x14f   :  { %v2020_v13 = vpop.eup %2019  ;;  %1408 = vst.msk [vmem:[%s2934_s3 + $0xc4] sm:$0xf] %vm1358_vm3, %v1671_v31  ;;  %v1676_v14 = vpack.c.bf16 %v1092_v40, %v1092_v40  ;;  %v1090_v37 = vmul.f32 %v2018_v26, %v2644_v39  ;;  %2039 = vpow2.f32 %v1519_v9  ;;  %v1523_v45 = vmul.f32 -1.442695, %v2806_v49 }
 0x150   :  { %v2022_v5 = vpop.eup %2021  ;;  %1381 = vst.msk [vmem:[%s2934_s3 + $0x58] sm:$0xf] %vm1358_vm3, %v1644_v16  ;;  %v1642_v48 = vpack.c.bf16 %v1058_v3, %v1058_v3  ;;  %v1061_v43 = vmul.f32 %v2020_v13, %v2648_v29  ;;  %2041 = vpow2.f32 %v1551_v59 }
 0x151   :  { %v2024_v42 = vpop.eup %2023  ;;  %1413 = vst.msk [vmem:[%s2934_s3 + $0xd8] sm:$0xf] %vm1358_vm3, %v1676_v14  ;;  %v1674_v53 = vpack.c.bf16 %v1090_v37, %v1090_v37  ;;  %v1093_v39 = vmul.f32 %v2022_v5, %v2652_v24  ;;  %2043 = vpow2.f32 %v1524_v20 }
 0x152   :  { %v2026_v60 = vpop.eup %2025  ;;  %1379 = vst.msk [vmem:[%s2934_s3 + $0x50] sm:$0xf] %vm1358_vm3, %v1642_v48  ;;  %v1645_v22 = vpack.c.bf16 %v1061_v43, %v1061_v43  ;;  %v1059_v29 = vmul.f32 %v2024_v42, %v2656_v32  ;;  %2045 = vpow2.f32 %v1556_v47 }
 0x153   :  { %v2028_v61 = vpop.eup %2027  ;;  %1411 = vst.msk [vmem:[%s2934_s3 + $0xd0] sm:$0xf] %vm1358_vm3, %v1674_v53  ;;  %v1677_v24 = vpack.c.bf16 %v1093_v39, %v1093_v39  ;;  %v1091_v51 = vmul.f32 %v2026_v60, %v2663_v55  ;;  %2047 = vpow2.f32 %v1522_v33 }
 0x154   :  { %v2030_v2 = vpop.eup %2029  ;;  %1382 = vst.msk [vmem:[%s2934_s3 + $0x5c] sm:$0xf] %vm1358_vm3, %v1645_v22  ;;  %v1643_v32 = vpack.c.bf16 %v1059_v29, %v1059_v29  ;;  %v1064_v15 = vmul.f32 %v2028_v61, %v2674_v19  ;;  %2049 = vpow2.f32 %v1554_v56 }
 0x155   :  { %v2032_v6 = vpop.eup %2031  ;;  %1414 = vst.msk [vmem:[%s2934_s3 + $0xdc] sm:$0xf] %vm1358_vm3, %v1677_v24  ;;  %v1675_v55 = vpack.c.bf16 %v1091_v51, %v1091_v51  ;;  %v1096_v36 = vmul.f32 %v2030_v2, %v2685_v27  ;;  %2051 = vpow2.f32 %v1525_v41 }
 0x156   :  { %v2034_v52 = vpop.eup %2033  ;;  %1380 = vst.msk [vmem:[%s2934_s3 + $0x54] sm:$0xf] %vm1358_vm3, %v1643_v32  ;;  %v1648_v19 = vpack.c.bf16 %v1064_v15, %v1064_v15  ;;  %v1062_v4 = vmul.f32 %v2032_v6, %v2694_v17  ;;  %2053 = vpow2.f32 %v1557_v30 }
 0x157   :  { %v2036_v0 = vpop.eup %2035  ;;  %1412 = vst.msk [vmem:[%s2934_s3 + $0xd4] sm:$0xf] %vm1358_vm3, %v1675_v55  ;;  %v1680_v7 = vpack.c.bf16 %v1096_v36, %v1096_v36  ;;  %v1094_v27 = vmul.f32 %v2034_v52, %v2703_v35  ;;  %2055 = vpow2.f32 %v1523_v45 }
 0x158   :  { %v2038_v23 = vpop.eup %2037  ;;  %1385 = vst.msk [vmem:[%s2934_s3 + $0x68] sm:$0xf] %vm1358_vm3, %v1648_v19  ;;  %v1646_v58 = vpack.c.bf16 %v1062_v4, %v1062_v4  ;;  %v873_v10 = vadd.f32 1.0, %v2036_v0  ;;  %2057 = vpow2.f32 %v1555_v54 }
 0x159   :  { %v2040_v17 = vpop.eup %2039  ;;  %1417 = vst.msk [vmem:[%s2934_s3 + $0xe8] sm:$0xf] %vm1358_vm3, %v1680_v7  ;;  %v1678_v9 = vpack.c.bf16 %v1094_v27, %v1094_v27  ;;  %v905_v59 = vadd.f32 1.0, %v2038_v23 }
 0x15a   :  { %v2042_v50 = vpop.eup %2041  ;;  %1383 = vst.msk [vmem:[%s2934_s3 + $0x60] sm:$0xf] %vm1358_vm3, %v1646_v58  ;;  %2059 = vrcp.f32 %v873_v10  ;;  %v871_v35 = vadd.f32 1.0, %v2040_v17 }
 0x15b   :  { %v2044_v57 = vpop.eup %2043  ;;  %1415 = vst.msk [vmem:[%s2934_s3 + $0xe0] sm:$0xf] %vm1358_vm3, %v1678_v9  ;;  %2061 = vrcp.f32 %v905_v59  ;;  %v903_v20 = vadd.f32 1.0, %v2042_v50 }
 0x15c   :  { %v2046_v47 = vpop.eup %2045  ;;  %2063 = vrcp.f32 %v871_v35  ;;  %v876_v21 = vadd.f32 1.0, %v2044_v57 }
 0x15d   :  { %v2048_v1 = vpop.eup %2047  ;;  %2065 = vrcp.f32 %v903_v20  ;;  %v908_v33 = vadd.f32 1.0, %v2046_v47 }
 0x15e   :  { %v2050_v56 = vpop.eup %2049  ;;  %2067 = vrcp.f32 %v876_v21  ;;  %v874_v8 = vadd.f32 1.0, %v2048_v1 }
 0x15f   :  { %v2052_v31 = vpop.eup %2051  ;;  %2069 = vrcp.f32 %v908_v33  ;;  %v906_v40 = vadd.f32 1.0, %v2050_v56 }
 0x160   :  { %v2054_v26 = vpop.eup %2053  ;;  %2071 = vrcp.f32 %v874_v8  ;;  %v877_v16 = vadd.f32 1.0, %v2052_v31 }
 0x161   :  { %v2056_v3 = vpop.eup %2055  ;;  %2073 = vrcp.f32 %v906_v40  ;;  %v909_v13 = vadd.f32 1.0, %v2054_v26 }
 0x162   :  { %v2058_v14 = vpop.eup %2057  ;;  %2075 = vrcp.f32 %v877_v16  ;;  %v875_v37 = vadd.f32 1.0, %v2056_v3 }
 0x163   :  { %2077 = vrcp.f32 %v909_v13  ;;  %v907_v5 = vadd.f32 1.0, %v2058_v14 }
 0x164   :  { %v2060_v48 = vpop.eup %2059  ;;  %2079 = vrcp.f32 %v875_v37 }
 0x165   :  { %v2062_v43 = vpop.eup %2061  ;;  %v1065_v42 = vmul.f32 %v2060_v48, %v2759_v11  ;;  %2081 = vrcp.f32 %v907_v5 }
 0x166   :  { %v2064_v53 = vpop.eup %2063  ;;  %v1097_v39 = vmul.f32 %v2062_v43, %v2762_v34 }
 0x167   :  { %v2066_v41 = vpop.eup %2065  ;;  %v1649_v60 = vpack.c.bf16 %v1065_v42, %v1065_v42  ;;  %v1063_v22 = vmul.f32 %v2064_v53, %v2765_v63 }
 0x168   :  { %v2068_v29 = vpop.eup %2067  ;;  %v1681_v30 = vpack.c.bf16 %v1097_v39, %v1097_v39  ;;  %v1095_v61 = vmul.f32 %v2066_v41, %v2768_v38 }
 0x169   :  { %v2070_v24 = vpop.eup %2069  ;;  %1386 = vst.msk [vmem:[%s2934_s3 + $0x6c] sm:$0xf] %vm1358_vm3, %v1649_v60  ;;  %v1647_v51 = vpack.c.bf16 %v1063_v22, %v1063_v22  ;;  %v1068_v11 = vmul.f32 %v2068_v29, %v2771_v18 }
 0x16a   :  { %v2072_v45 = vpop.eup %2071  ;;  %1418 = vst.msk [vmem:[%s2934_s3 + $0xec] sm:$0xf] %vm1358_vm3, %v1681_v30  ;;  %v1679_v34 = vpack.c.bf16 %v1095_v61, %v1095_v61  ;;  %v1100_v63 = vmul.f32 %v2070_v24, %v2774_v62 }
 0x16b   :  { %v2074_v2 = vpop.eup %2073  ;;  %1384 = vst.msk [vmem:[%s2934_s3 + $0x64] sm:$0xf] %vm1358_vm3, %v1647_v51  ;;  %v1652_v38 = vpack.c.bf16 %v1068_v11, %v1068_v11  ;;  %v1066_v32 = vmul.f32 %v2072_v45, %v2777_v44 }
 0x16c   :  { %v2076_v15 = vpop.eup %2075  ;;  %1416 = vst.msk [vmem:[%s2934_s3 + $0xe4] sm:$0xf] %vm1358_vm3, %v1679_v34  ;;  %v1684_v18 = vpack.c.bf16 %v1100_v63, %v1100_v63  ;;  %v1098_v54 = vmul.f32 %v2074_v2, %v2780_v12 }
 0x16d   :  { %v2078_v6 = vpop.eup %2077  ;;  %1389 = vst.msk [vmem:[%s2934_s3 + $0x78] sm:$0xf] %vm1358_vm3, %v1652_v38  ;;  %v1650_v62 = vpack.c.bf16 %v1066_v32, %v1066_v32  ;;  %v1069_v55 = vmul.f32 %v2076_v15, %v2794_v25 }
 0x16e   :  { %v2080_v36 = vpop.eup %2079  ;;  %1421 = vst.msk [vmem:[%s2934_s3 + $0xf8] sm:$0xf] %vm1358_vm3, %v1684_v18  ;;  %v1682_v44 = vpack.c.bf16 %v1098_v54, %v1098_v54  ;;  %v1101_v52 = vmul.f32 %v2078_v6, %v2798_v46 }
 0x16f   :  { %v2082_v19 = vpop.eup %2081  ;;  %1387 = vst.msk [vmem:[%s2934_s3 + $0x70] sm:$0xf] %vm1358_vm3, %v1650_v62  ;;  %v1653_v12 = vpack.c.bf16 %v1069_v55, %v1069_v55  ;;  %v1067_v4 = vmul.f32 %v2080_v36, %v2806_v49 }
 0x170   :  { %1419 = vst.msk [vmem:[%s2934_s3 + $0xf0] sm:$0xf] %vm1358_vm3, %v1682_v44  ;;  %v1685_v25 = vpack.c.bf16 %v1101_v52, %v1101_v52  ;;  %v1099_v0 = vmul.f32 %v2082_v19, %v2814_v28 }
 0x171   :  { %1390 = vst.msk [vmem:[%s2934_s3 + $0x7c] sm:$0xf] %vm1358_vm3, %v1653_v12  ;;  %v1651_v46 = vpack.c.bf16 %v1067_v4, %v1067_v4 }
 0x172   :  { %1422 = vst.msk [vmem:[%s2934_s3 + $0xfc] sm:$0xf] %vm1358_vm3, %v1685_v25  ;;  %v1683_v49 = vpack.c.bf16 %v1099_v0, %v1099_v0 }
 0x173   :  { %1388 = vst.msk [vmem:[%s2934_s3 + $0x74] sm:$0xf] %vm1358_vm3, %v1651_v46 }
 0x174   :  { %1420 = vst.msk [vmem:[%s2934_s3 + $0xf4] sm:$0xf] %vm1358_vm3, %v1683_v49 }

</bundles_post_ra>
